<compile_context>
chip_gen: v7x
topology: tpu7x:2x2x1
jax: 0.10.0
libtpu: 0.0.40
codegen_flags: <defaults>
</compile_context>

<pallas_src>
import functools

import jax
import jax.numpy as jnp
from jax.experimental import pallas as pl
from jax.experimental.pallas import tpu as pltpu

_TM_CAP = 32768  # review: let the VMEM budget be the real limiter (was 4096)


def _elementwise_pow(x, power):
    """x**power. Integer powers stay on the VPU via square-and-multiply
    (~log2(p) multiplies); non-integer powers fall back to exp/log on the EUP."""
    if isinstance(power, int) and power >= 1:
        result = None
        base = x
        p = power
        while p > 0:
            if p & 1:
                result = base if result is None else result * base
            p >>= 1
            if p:
                base = base * base
        return result
    return jnp.power(x, power)


def _normalize_kernel(x_ref, o_ref, *, power):
    """Plain path: per-row reduce along lanes (used when D >= 128 or D∤128)."""
    x = x_ref[...].astype(jnp.float32)
    if power == 2:
        s = jnp.sum(x * x, axis=1, keepdims=True)
        inv = jax.lax.rsqrt(s)                       # per-row EUP op
    else:
        xp = _elementwise_pow(x, power)
        s = jnp.sum(xp, axis=1, keepdims=True)
        inv = 1.0 / jnp.power(s, 1.0 / power)        # per-row EUP transcendentals
    # Exact module semantics: no eps/abs; zero-norm rows give inf/NaN like torch.
    # Scale in the native dtype (packed bf16 VALU on v6e/v7x; fine on f32).
    o_ref[...] = x_ref[...] * inv.astype(o_ref.dtype)


def _normalize_packed_kernel(bd_ref, x_ref, o_ref, *, power):
    """Lane-dense path: rows packed `pack` per 128-lane row. bd_ref is a
    128x128 block-diagonal-of-ones matrix; one MXU matmul gives every D-lane
    group its own row-sum, already broadcast across the group."""
    x = x_ref[...].astype(jnp.float32)
    xp = x * x if power == 2 else _elementwise_pow(x, power)
    s = jnp.dot(xp, bd_ref[...], preferred_element_type=jnp.float32)
    if power == 2:
        inv = jax.lax.rsqrt(s)
    else:
        inv = 1.0 / jnp.power(s, 1.0 / power)
    o_ref[...] = x_ref[...] * inv.astype(o_ref.dtype)


def _vmem_params():
    """(working-set budget, vmem_limit_bytes) derived from one per-generation
    query, so budget and limit can't drift apart."""
    cap = None
    try:
        cap = pltpu.get_tpu_info().vmem_capacity_bytes
    except Exception:
        cap = None  # interpret mode / unknown chip -> be conservative (v7x-like)
    if cap is not None and cap >= 100 * 1024 * 1024:
        # v5e / v6e: 128 MiB physical VMEM.
        return 40 * 1024 * 1024, 96 * 1024 * 1024
    # v7x (64 MiB per TC) or unknown: stay inside the 32 MiB scoped default.
    return 16 * 1024 * 1024, 32 * 1024 * 1024


def _pick_row_tile(n_rows, lane_d, itemsize, budget_bytes):
    """Largest row tile whose double-buffered working set fits the budget."""
    align = 8 if itemsize >= 4 else 16  # sub-32-bit dtypes pack (16, 128) vregs
    # 2x double-buffered input + 2x double-buffered output + ~3 f32 temporaries.
    bytes_per_row = lane_d * (4 * itemsize + 3 * 4)
    tm = budget_bytes // max(bytes_per_row, 1)
    tm = max(align, (tm // align) * align)
    tm = min(tm, _TM_CAP)
    if n_rows <= tm:
        return n_rows  # single block == full array dim: always layout-legal
    return tm
    # TODO(synk): very large D (bytes_per_row > budget) would need a D-tiled
    # two-pass partial-sum path; tm floors at `align` and may exceed the limit.


def normalize(x, power=2):
    """Pallas TPU implementation of Normalize(power).forward(x) for 2-D x (N, D)."""
    N, D = x.shape
    in_dtype = x.dtype
    itemsize = jnp.dtype(in_dtype).itemsize
    budget, vmem_limit = _vmem_params()

    # Lane-dense repack for small D (production D=32): pack = 128 // D rows per
    # 128-lane row. The reshape is row-major contiguous, i.e. free in XLA.
    pack = 128 // D if (D < 128 and 128 % D == 0) else 1

    compiler_kwargs = dict(
        # Row axis is embarrassingly parallel -> megacore sharding on v7x.
        dimension_semantics=("parallel",),
        vmem_limit_bytes=vmem_limit,
    )

    if pack > 1:
        rows = -(-N // pack)
        n_pad = rows * pack - N
        xw = jnp.pad(x, ((0, n_pad), (0, 0))) if n_pad else x
        xw = xw.reshape(rows, 128)
        grp = jnp.arange(128, dtype=jnp.int32) // D
        blockdiag = (grp[:, None] == grp[None, :]).astype(jnp.float32)

        tm = _pick_row_tile(rows, 128, itemsize, budget)
        grid = (pl.cdiv(rows, tm),)
        kernel = functools.partial(_normalize_packed_kernel, power=power)
        out = pl.pallas_call(
            kernel,
            out_shape=jax.ShapeDtypeStruct((rows, 128), in_dtype),
            grid_spec=pltpu.PrefetchScalarGridSpec(
                num_scalar_prefetch=0,
                grid=grid,
                in_specs=[
                    # Constant block index -> fetched once, stays resident.
                    pl.BlockSpec((128, 128), lambda i: (0, 0)),
                    pl.BlockSpec((tm, 128), lambda i: (i, 0)),
                ],
                out_specs=pl.BlockSpec((tm, 128), lambda i: (i, 0)),
            ),
            compiler_params=pltpu.CompilerParams(**compiler_kwargs),
        )(blockdiag, xw)
        out = out.reshape(rows * pack, D)
        return out[:N] if n_pad else out

    # Plain path: D is already lane-dense (>=128) or doesn't divide 128.
    tm = _pick_row_tile(N, D, itemsize, budget)
    grid = (pl.cdiv(N, tm),)  # ragged last block is fine: reduction is per-row
    kernel = functools.partial(_normalize_kernel, power=power)
    return pl.pallas_call(
        kernel,
        out_shape=jax.ShapeDtypeStruct((N, D), in_dtype),
        grid_spec=pltpu.PrefetchScalarGridSpec(
            num_scalar_prefetch=0,
            grid=grid,
            in_specs=[pl.BlockSpec((tm, D), lambda i: (i, 0))],
            out_specs=pl.BlockSpec((tm, D), lambda i: (i, 0)),
        ),
        compiler_params=pltpu.CompilerParams(**compiler_kwargs),
    )(x)


if __name__ == "__main__":
    key = jax.random.PRNGKey(0)
    # Small feature-matrix input, consistent with comatch's use of Normalize on
    # projection-head outputs: (batch, feature_dim). Exercises the packed path.
    x = jax.random.normal(key, (8, 32), dtype=jnp.float32)

    out = jax.block_until_ready(normalize(x, power=2))
    norm_ref = jnp.sqrt(jnp.sum(x * x, axis=1, keepdims=True))
    ref = x / norm_ref
    assert out.shape == x.shape and out.dtype == x.dtype
    assert jnp.allclose(out, ref, atol=1e-5, rtol=1e-5), "power=2 mismatch"

    # Non-default power on a longer, packed stream. Positive inputs so the 1/3
    # root is well defined (negative row-sums give NaN in torch too; the old
    # test failed only because NaN != NaN in allclose).
    x2 = jnp.abs(jax.random.normal(jax.random.PRNGKey(1), (1000, 32),
                                   dtype=jnp.float32)) + 0.1
    out3 = jax.block_until_ready(normalize(x2, power=3))
    norm3 = jnp.power(jnp.sum(x2 ** 3, axis=1, keepdims=True), 1.0 / 3.0)
    assert jnp.allclose(out3, x2 / norm3, atol=1e-4, rtol=1e-4), "power=3 mismatch"

    # Plain (non-packed) path: D >= 128 with ragged N.
    x3 = jax.random.normal(jax.random.PRNGKey(2), (37, 256), dtype=jnp.float32)
    out2 = jax.block_until_ready(normalize(x3, power=2))
    ref2 = x3 / jnp.sqrt(jnp.sum(x3 * x3, axis=1, keepdims=True))
    assert jnp.allclose(out2, ref2, atol=1e-5, rtol=1e-5), "D=256 mismatch"

    print("KERNEL_OK")
</pallas_src>

<mosaic_0001>
module attributes {stable_mosaic.version = 11 : i64} {
  func.func @_normalize_packed_kernel(%arg0: i32, %arg1: memref<128x128xf32, #tpu.memory_space<vmem>>, %arg2: memref<2x128xf32, #tpu.memory_space<vmem>>, %arg3: memref<2x128xf32, #tpu.memory_space<vmem>>) attributes {dimension_semantics = [#tpu.dimension_semantics<parallel>], iteration_bounds = array<i64: 1>, scalar_prefetch = 0 : i64, scratch_operands = 0 : i64, tpu.core_type = #tpu.core_type<tc>, window_params = [{pipeline_mode = #tpu.pipeline_mode<synchronous>, transform_indices = @transform_0, window_bounds = array<i64: 128, 128>}, {transform_indices = @transform_1, window_bounds = array<i64: 2, 128>}, {transform_indices = @transform_2, window_bounds = array<i64: 2, 128>}]} {
    %c0 = arith.constant 0 : index
    %c0_0 = arith.constant 0 : index
    %0 = vector.load %arg2[%c0, %c0_0] : memref<2x128xf32, #tpu.memory_space<vmem>>, vector<2x128xf32>
    %1 = arith.mulf %0, %0 : vector<2x128xf32>
    %c0_1 = arith.constant 0 : index
    %c0_2 = arith.constant 0 : index
    %2 = vector.load %arg1[%c0_1, %c0_2] : memref<128x128xf32, #tpu.memory_space<vmem>>, vector<128x128xf32>
    %cst = arith.constant dense<0.000000e+00> : vector<2x128xf32>
    %3 = tpu.matmul %1, %2, %cst {dimension_numbers = #tpu.dot_dimension_numbers<[1], [0], [0], [1], [0, 0, 1, 1], [], []>} : vector<2x128xf32>, vector<128x128xf32>, vector<2x128xf32> -> vector<2x128xf32>
    %4 = math.rsqrt %3 : vector<2x128xf32>
    %c0_3 = arith.constant 0 : index
    %c0_4 = arith.constant 0 : index
    %5 = vector.load %arg2[%c0_3, %c0_4] : memref<2x128xf32, #tpu.memory_space<vmem>>, vector<2x128xf32>
    %6 = arith.mulf %5, %4 : vector<2x128xf32>
    %c0_5 = arith.constant 0 : index
    %c0_6 = arith.constant 0 : index
    %7 = vector.load %arg3[%c0_5, %c0_6] : memref<2x128xf32, #tpu.memory_space<vmem>>, vector<2x128xf32>
    tpu.vector_store %arg3[%c0_5, %c0_6], %6 {strides = array<i32>} : memref<2x128xf32, #tpu.memory_space<vmem>>, vector<2x128xf32>,
    return
  }
  func.func @transform_0(%arg0: i32) -> (i32, i32) {
    %c0_i32 = arith.constant 0 : i32
    %c0_i32_0 = arith.constant 0 : i32
    %c0_i32_1 = arith.constant 0 : i32
    return %c0_i32, %c0_i32_0 : i32, i32
  }
  func.func @transform_1(%arg0: i32) -> (i32, i32) {
    %c0_i32 = arith.constant 0 : i32
    %c0_i32_0 = arith.constant 0 : i32
    return %arg0, %c0_i32 : i32, i32
  }
  func.func @transform_2(%arg0: i32) -> (i32, i32) {
    %c0_i32 = arith.constant 0 : i32
    %c0_i32_0 = arith.constant 0 : i32
    return %arg0, %c0_i32 : i32, i32
  }
}

</mosaic_0001>

<bundles_post_ra>
// kernel: tpu_custom_call.1
= control target key start
LH: loop header
LB: loop body
LE: loop exit
PB: predicated region body
PF: predicated region fallthrough
CT: control target
= control target key end

     0   :  { %7 = vsyncpa [#allocation3], 0  ;;  %s314_s0 = inlined_call_operand.hbm [shape: f32[128,128], index: 0, kind: input, shape index: {}]   ;;  %s315_s1 = inlined_call_operand.vmem [shape: f32[2,128], index: 1, kind: input, shape index: {}]   ;;  %s316_s2 = inlined_call_operand.hbm [shape: f32[2,128], index: 2, kind: output, shape index: {}]  }
   0x1   :  { %8 = vsyncpa [#allocation4], 0  ;;  %s265_s9 = smov [#allocation2]   ;;  %s217_s13 = scalar_lea.hbm %s314_s0, 2048 }
   0x2   :  { %s14_s10 = sshll.u32 %s265_s9, 4  ;;  %p218_p0 = scmp.ne.s32.totalorder %s314_s0, %s217_s13  ;;  %s15_s10 = int_to_ptr.vmem [resolvable:$true] %s14_s10 }
   0x3   :  { %p221_p1 = scmp.lt.u32.totalorder %s217_s13, %s314_s0 }
   0x5   :  { %p223_p2 = pnand %p221_p1, %p218_p0 }
   0x7   :  { %226 = shalt.err (!%p223_p2)
}
   0x8   :  { %s227_s18 = scalar_lea.vmem %s15_s10, 2048  ;;  %p232_p4 = scmp.lt.s32.totalorder %s15_s10, %s15_s10 }
   0x9   :  { %p228_p3 = scmp.ne.s32.totalorder %s15_s10, %s227_s18  ;;  %p233_p5 = scmp.lt.s32.totalorder %s227_s18, %s227_s18 }
   0xb   :  { %p234_p6 = por %p233_p5, %p232_p4 }
   0xd   :  { %p235_p7 = pnand %p234_p6, %p228_p3 }
   0xf   :  { %238 = shalt.err (!%p235_p7)
}
  0x10   :  { %s266_s19 = smov 128   ;;  %s267_s20 = smov 8  }
  0x11   :  { %20 = dma.hbm_to_vmem [thread:$0]  %s314_s0, 2048, %s15_s10, [#allocation3], %s266_s19, %s266_s19, %s267_s20  }
  0x12   :  { %261 = dma.done.wait [#allocation3], 2048  }
  0x13   :  { %262 = vsyncadd [#allocation3], 4294965248  ;;  %v268_v0 = vmov 0.0|0.0   ;;  %vm269_vm0 = vmmov 0   ;;  %v270_v1 = vmov 0.0   ;;  %v28_v2 = vld [vmem:[#allocation2] sm:$0xff] }
  0x14   :  { %184 = vmatprep.subr.bf16.mxu0 %v268_v0  ;;  %181 = vmatprep.mubr.msk.f32.mxu0 %vm269_vm0, %v270_v1  ;;  %v29_v3 = vld [vmem:[#allocation2 + $0x8] sm:$0xff]  ;;  %v30_v4 = vld [vmem:[#allocation2 + $0x10] sm:$0xff]  ;;  %v31_v6 = vld [vmem:[#allocation2 + $0x18] sm:$0xff]  ;;  %s271_s24 = smov [#allocation5]  }
  0x15   :  { %v185_v5 = vpack.c.bf16 %v29_v3, %v28_v2  ;;  %v188_v7 = vpack.c.bf16 %v31_v6, %v30_v4  ;;  %v32_v8 = vld [vmem:[#allocation2 + $0x20] sm:$0xff]  ;;  %v33_v9 = vld [vmem:[#allocation2 + $0x28] sm:$0xff]  ;;  %v34_v11 = vld [vmem:[#allocation2 + $0x30] sm:$0xff]  ;;  %s123_s25 = sshll.u32 %s271_s24, 4  ;;  %s124_s25 = int_to_ptr.vmem [resolvable:$true] %s123_s25 }
  0x16   :  { %v191_v10 = vpack.c.bf16 %v33_v9, %v32_v8  ;;  %v35_v12 = vld [vmem:[#allocation2 + $0x38] sm:$0xff]  ;;  %v36_v14 = vld [vmem:[#allocation2 + $0x40] sm:$0xff]  ;;  %v37_v15 = vld [vmem:[#allocation2 + $0x48] sm:$0xff]  ;;  %s239_s26 = scalar_lea.vmem %s124_s25, 32  ;;  %p244_p9 = scmp.lt.s32.totalorder %s124_s25, %s124_s25 }
  0x17   :  { %186 = vmatpush3.bf16.msra.mxu0 %v185_v5  ;;  %v194_v13 = vpack.c.bf16 %v35_v12, %v34_v11  ;;  %v197_v16 = vpack.c.bf16 %v37_v15, %v36_v14  ;;  %v38_v17 = vld [vmem:[#allocation2 + $0x50] sm:$0xff]  ;;  %v39_v18 = vld [vmem:[#allocation2 + $0x58] sm:$0xff]  ;;  %v40_v20 = vld [vmem:[#allocation2 + $0x60] sm:$0xff]  ;;  %p240_p8 = scmp.ne.s32.totalorder %s124_s25, %s239_s26  ;;  %p245_p10 = scmp.lt.s32.totalorder %s239_s26, %s239_s26 }
  0x18   :  { %187 = vmatprep.subr.bf16.mxu0 %v268_v0  ;;  %v200_v19 = vpack.c.bf16 %v39_v18, %v38_v17  ;;  %v41_v21 = vld [vmem:[#allocation2 + $0x68] sm:$0xff]  ;;  %v42_v23 = vld [vmem:[#allocation2 + $0x70] sm:$0xff]  ;;  %v43_v24 = vld [vmem:[#allocation2 + $0x78] sm:$0xff] }
  0x19   :  { %v203_v22 = vpack.c.bf16 %v41_v21, %v40_v20  ;;  %v206_v25 = vpack.c.bf16 %v43_v24, %v42_v23  ;;  %v26_v26 = vld [vmem:[%s315_s1] sm:$0x3]  ;;  %p246_p11 = por %p245_p10, %p244_p9 }
  0x1a   :  { %v27_v27 = vmul.f32 %v26_v26, %v26_v26 }
  0x1b   :  { %189 = vmatpush3.bf16.msra.mxu0 %v188_v7  ;;  %p247_p12 = pnand %p246_p11, %p240_p8 }
  0x1c   :  { %190 = vmatprep.subr.bf16.mxu0 %v268_v0 }
  0x1f   :  { %192 = vmatpush3.bf16.msra.mxu0 %v191_v10 }
  0x20   :  { %193 = vmatprep.subr.bf16.mxu0 %v268_v0 }
  0x23   :  { %195 = vmatpush3.bf16.msra.mxu0 %v194_v13 }
  0x24   :  { %196 = vmatprep.subr.bf16.mxu0 %v268_v0 }
  0x27   :  { %198 = vmatpush3.bf16.msra.mxu0 %v197_v16 }
  0x28   :  { %199 = vmatprep.subr.bf16.mxu0 %v268_v0 }
  0x2b   :  { %201 = vmatpush3.bf16.msra.mxu0 %v200_v19 }
  0x2c   :  { %202 = vmatprep.subr.bf16.mxu0 %v268_v0 }
  0x2f   :  { %204 = vmatpush3.bf16.msra.mxu0 %v203_v22 }
  0x30   :  { %205 = vmatprep.subr.bf16.mxu0 %v268_v0 }
  0x33   :  { %207 = vmatpush3.bf16.msra.mxu0 %v206_v25 }
  0x36   :  { %182 = vmatmul.mubr.f32.vlgmr.msra.gmra.mrb[0].mxu0 %v27_v27 }
 0x109   :  { %v110_v28 = vpop.f32.mrb[0].mxu0 }
 0x10a   :  { %215 = vrsqrt.f32 %v110_v28  ;;  %v183_v29 = vpop.f32.mrb[1].mxu0 }
 0x114   :  { %v216_v30 = vpop.eup %215 }
 0x115   :  { %v115_v31 = vmul.f32 %v216_v30, %v26_v26 }
 0x117   :  { %116 = vst [vmem:[#allocation5] sm:$0x3] %v115_v31 }
 0x118   :  { %250 = shalt.err (!%p247_p12)
}
 0x119   :  { %s251_s28 = scalar_lea.hbm %s316_s2, 32 }
 0x11a   :  { %p252_p13 = scmp.ne.s32.totalorder %s316_s2, %s251_s28  ;;  %p255_p0 = scmp.lt.u32.totalorder %s251_s28, %s316_s2 }
 0x11c   :  { %p257_p1 = pnand %p255_p0, %p252_p13 }
 0x11e   :  { %260 = shalt.err (!%p257_p1)
}
 0x11f   :  { %126 = dma.vmem_to_hbm [thread:$0]  %s124_s25, 32, %s316_s2, [#allocation4]  }
 0x120   :  { %263 = dma.done.wait [#allocation4], 32  }
 0x121   :  { %264 = vsyncadd [#allocation4], 4294967264 }
 0x122   :  { %130 = vsyncpa [#allocation3], 1 }
 0x123   :  { %131 = vsyncpa [#allocation4], 1 }

</bundles_post_ra>
